<compile_context>
chip_gen: v5e
topology: v5e:2x2
jax: 0.10.0
libtpu: 0.0.40
codegen_flags: <defaults>
</compile_context>

<pallas_src>
import math

import jax
import jax.numpy as jnp
from jax.experimental import pallas as pl
from jax.experimental.pallas import tpu as pltpu


def _round_up(x, m):
    return ((x + m - 1) // m) * m


def _pad2d(a, rows, cols):
    r, c = a.shape
    return jnp.pad(a, ((0, rows - r), (0, cols - c)))


def _ps_kernel(s_ref, w1_ref, w2_ref, ps_ref, h_acc):
    """ps[row tile] = relu(S[row tile] @ W1) @ W2, K-tiled over columns of S."""
    k = pl.program_id(1)

    @pl.when(k == 0)
    def _():
        h_acc[...] = jnp.zeros_like(h_acc)

    h_acc[...] += jnp.dot(s_ref[...], w1_ref[...],
                          preferred_element_type=jnp.float32)

    @pl.when(k == pl.num_programs(1) - 1)
    def _():
        h = jnp.maximum(h_acc[...], 0.0).astype(jnp.bfloat16)
        ps_ref[...] = jnp.dot(
            h, w2_ref[...], preferred_element_type=jnp.float32
        ).astype(ps_ref.dtype)


def _out_kernel(s_ref, ps_ref, o_ref, acc):
    """out[row tile] = S[row tile] @ ps, K-tiled over columns of S."""
    k = pl.program_id(1)

    @pl.when(k == 0)
    def _():
        acc[...] = jnp.zeros_like(acc)

    acc[...] += jnp.dot(s_ref[...], ps_ref[...],
                        preferred_element_type=jnp.float32)

    @pl.when(k == pl.num_programs(1) - 1)
    def _():
        o_ref[...] = acc[...]


def gcn_forward(x, supports, W1, W2, *, tm=256, tk=512):
    """out = S_sum @ (relu(S_sum @ W1) @ W2) with two tiled pallas_calls."""
    del x  # layer1 is featureless; x is unused exactly as in the PyTorch module.

    # Sum the supports once in the wrapper (f32 add, single bf16 cast).
    s_sum = supports[0].astype(jnp.float32)
    for s in supports[1:]:
        s_sum = s_sum + s.astype(jnp.float32)

    N = s_sum.shape[0]
    hidden, num_classes = W2.shape
    assert W1.shape == (N, hidden)

    # Lane/sublane-friendly padded sizes (zero padding is numerically exact).
    Hp = _round_up(hidden, 128)        # 200 -> 256
    Cp = _round_up(num_classes, 128)   # 10  -> 128 (lane-dense output stores)

    # Tile sizes: multiples of 128 (>= MXU row width on v5e; 256 default fills
    # v6e/v7x's 256-wide MXU), clamped for tiny problems. tk is forced to a
    # multiple of tm so a single padded Np divides both cleanly.
    tm = max(128, (tm // 128) * 128)
    tm = min(tm, _round_up(N, 128))
    np0 = _round_up(N, tm)
    tk = max(tm, min(tk, np0))
    tk = _round_up(tk, tm)
    Np = _round_up(N, tk)

    s_bf = _pad2d(s_sum, Np, Np).astype(jnp.bfloat16)
    w1p = _pad2d(W1.astype(jnp.float32), Np, Hp).astype(jnp.bfloat16)
    w2p = _pad2d(W2.astype(jnp.float32), Hp, Cp).astype(jnp.bfloat16)

    bpe_bf16, bpe_f32 = 2, 4

    def _vmem_limit(est_bytes):
        # 2x headroom, floored at the smallest default scoped limit, capped
        # well below v7x's 64 MiB physical VMEM.
        return int(min(max(2 * est_bytes, 16 * 1024 * 1024), 48 * 1024 * 1024))

    # --- pass 1: ps = relu(S @ W1) @ W2 (per row tile, K-reduced) -----------
    vmem_a = (2 * tm * tk * bpe_bf16      # S row/K tile (double-buffered)
              + 2 * tk * Hp * bpe_bf16    # W1 K tile
              + 2 * Hp * Cp * bpe_bf16    # W2 (small, resident)
              + 2 * tm * Cp * bpe_bf16    # ps output tile
              + tm * Hp * bpe_f32)        # h accumulator scratch
    cost_a = pl.CostEstimate(
        flops=2 * Np * Np * Hp + 2 * Np * Hp * Cp,
        transcendentals=0,
        bytes_accessed=(Np * Np + Np * Hp + Hp * Cp + Np * Cp) * bpe_bf16)

    ps = pl.pallas_call(
        _ps_kernel,
        out_shape=jax.ShapeDtypeStruct((Np, Cp), jnp.bfloat16),
        grid=(Np // tm, Np // tk),
        in_specs=[
            pl.BlockSpec((tm, tk), lambda i, k: (i, k)),   # S row/K tile
            pl.BlockSpec((tk, Hp), lambda i, k: (k, 0)),   # W1 K tile
            pl.BlockSpec((Hp, Cp), lambda i, k: (0, 0)),   # W2 (resident)
        ],
        out_specs=pl.BlockSpec((tm, Cp), lambda i, k: (i, 0)),
        scratch_shapes=[pltpu.VMEM((tm, Hp), jnp.float32)],
        compiler_params=pltpu.CompilerParams(
            dimension_semantics=("parallel", "arbitrary"),
            vmem_limit_bytes=_vmem_limit(vmem_a)),
        cost_estimate=cost_a,
    )(s_bf, w1p, w2p)

    # --- pass 2: out = S @ ps (per row tile, K-reduced) ----------------------
    vmem_b = (2 * tm * tk * bpe_bf16      # S row/K tile
              + 2 * tk * Cp * bpe_bf16    # ps K tile
              + 2 * tm * Cp * bpe_f32     # output tile
              + tm * Cp * bpe_f32)        # accumulator scratch
    cost_b = pl.CostEstimate(
        flops=2 * Np * Np * Cp,
        transcendentals=0,
        bytes_accessed=(Np * Np + Np * Cp) * bpe_bf16 + Np * Cp * bpe_f32)

    out_p = pl.pallas_call(
        _out_kernel,
        out_shape=jax.ShapeDtypeStruct((Np, Cp), jnp.float32),
        grid=(Np // tm, Np // tk),
        in_specs=[
            pl.BlockSpec((tm, tk), lambda i, k: (i, k)),   # S row/K tile
            pl.BlockSpec((tk, Cp), lambda i, k: (k, 0)),   # ps K tile
        ],
        out_specs=pl.BlockSpec((tm, Cp), lambda i, k: (i, 0)),
        scratch_shapes=[pltpu.VMEM((tm, Cp), jnp.float32)],
        compiler_params=pltpu.CompilerParams(
            dimension_semantics=("parallel", "arbitrary"),
            vmem_limit_bytes=_vmem_limit(vmem_b)),
        cost_estimate=cost_b,
    )(s_bf, ps)

    return out_p[:N, :num_classes]


if __name__ == "__main__":
    key = jax.random.PRNGKey(0)
    k_s0, k_s1, k_w1, k_w2, k_x = jax.random.split(key, 5)

    # Small deterministic problem: N nodes == input_dim (TextGCN convention).
    N = 64            # number of graph nodes == input_dim
    HIDDEN = 200      # fixed by GCN.__init__ (layer1 output dim)
    NUM_CLASSES = 10  # default num_classes

    supports = [
        jax.random.uniform(k_s0, (N, N), dtype=jnp.float32) / N,
        jax.random.uniform(k_s1, (N, N), dtype=jnp.float32) / N,
    ]
    W1 = jax.random.normal(k_w1, (N, HIDDEN), dtype=jnp.float32)
    W2 = jax.random.normal(k_w2, (HIDDEN, NUM_CLASSES), dtype=jnp.float32)
    # Node features: unused by the featureless first layer, kept for API parity.
    x = jax.random.normal(k_x, (N, N), dtype=jnp.float32)

    # TODO(synk): dropout_rate=0.0 in the PyTorch module -> identity; a nonzero
    # rate would need pltpu.prng_seed/prng_random_bits masking, not implemented.
    out = jax.block_until_ready(gcn_forward(x, supports, W1, W2))
    assert out.shape == (N, NUM_CLASSES)

    # Reference 1: emulate the kernel's bf16-input / f32-accumulate math.
    s_sum = supports[0] + supports[1]
    s_bf = s_sum.astype(jnp.bfloat16)
    h_ref = jnp.maximum(jnp.dot(s_bf, W1.astype(jnp.bfloat16),
                                preferred_element_type=jnp.float32), 0.0)
    ps_ref = jnp.dot(h_ref.astype(jnp.bfloat16), W2.astype(jnp.bfloat16),
                     preferred_element_type=jnp.float32).astype(jnp.bfloat16)
    ref_bf16 = jnp.dot(s_bf, ps_ref, preferred_element_type=jnp.float32)
    assert jnp.allclose(out, ref_bf16, atol=1e-3, rtol=1e-3), (
        float(jnp.max(jnp.abs(out - ref_bf16))))

    # Reference 2: pure f32 math (the PyTorch module); tolerance sized for
    # bf16 MXU inputs with f32 accumulation.
    ref_f32 = s_sum @ (jnp.maximum(s_sum @ W1, 0.0) @ W2)
    assert jnp.allclose(out, ref_f32, atol=3e-2, rtol=3e-2), (
        float(jnp.max(jnp.abs(out - ref_f32))))

    print("KERNEL_OK")
</pallas_src>

<mosaic_0001>
module attributes {stable_mosaic.version = 11 : i64} {
  func.func @_ps_kernel(%arg0: i32, %arg1: i32, %arg2: memref<128x128xbf16, #tpu.memory_space<vmem>>, %arg3: memref<128x256xbf16, #tpu.memory_space<vmem>>, %arg4: memref<256x128xbf16, #tpu.memory_space<vmem>>, %arg5: memref<128x128xbf16, #tpu.memory_space<vmem>>, %arg6: memref<128x256xf32, #tpu.memory_space<vmem>>) attributes {dimension_semantics = [#tpu.dimension_semantics<parallel>, #tpu.dimension_semantics<arbitrary>], iteration_bounds = array<i64: 1, 1>, scalar_prefetch = 0 : i64, scratch_operands = 1 : i64, tpu.core_type = #tpu.core_type<tc>, window_params = [{transform_indices = @transform_0, window_bounds = array<i64: 128, 128>}, {transform_indices = @transform_1, window_bounds = array<i64: 128, 256>}, {pipeline_mode = #tpu.pipeline_mode<synchronous>, transform_indices = @transform_2, window_bounds = array<i64: 256, 128>}, {transform_indices = @transform_3, window_bounds = array<i64: 128, 128>}]} {
    %c0_i32 = arith.constant 0 : i32
    %0 = arith.cmpi eq, %arg1, %c0_i32 : i32
    %1 = arith.extui %0 : i1 to i32
    %c0_i32_0 = arith.constant 0 : i32
    %2 = arith.cmpi ne, %1, %c0_i32_0 : i32
    scf.if %2 {
      %cst_10 = arith.constant 0.000000e+00 : f32
      %12 = vector.broadcast %cst_10 : f32 to vector<128x256xf32>
      %c0_11 = arith.constant 0 : index
      %c0_12 = arith.constant 0 : index
      %13 = vector.load %arg6[%c0_11, %c0_12] : memref<128x256xf32, #tpu.memory_space<vmem>>, vector<128x256xf32>
      tpu.vector_store %arg6[%c0_11, %c0_12], %12 {strides = array<i32>} : memref<128x256xf32, #tpu.memory_space<vmem>>, vector<128x256xf32>,
    } else {
    }
    %c0 = arith.constant 0 : index
    %c0_1 = arith.constant 0 : index
    %3 = vector.load %arg6[%c0, %c0_1] : memref<128x256xf32, #tpu.memory_space<vmem>>, vector<128x256xf32>
    %c0_2 = arith.constant 0 : index
    %c0_3 = arith.constant 0 : index
    %4 = vector.load %arg2[%c0_2, %c0_3] : memref<128x128xbf16, #tpu.memory_space<vmem>>, vector<128x128xbf16>
    %c0_4 = arith.constant 0 : index
    %c0_5 = arith.constant 0 : index
    %5 = vector.load %arg3[%c0_4, %c0_5] : memref<128x256xbf16, #tpu.memory_space<vmem>>, vector<128x256xbf16>
    %cst = arith.constant dense<0.000000e+00> : vector<128x256xf32>
    %6 = tpu.matmul %4, %5, %cst {dimension_numbers = #tpu.dot_dimension_numbers<[1], [0], [0], [1], [0, 0, 1, 1], [], []>} : vector<128x128xbf16>, vector<128x256xbf16>, vector<128x256xf32> -> vector<128x256xf32>
    %7 = arith.addf %3, %6 : vector<128x256xf32>
    %c0_6 = arith.constant 0 : index
    %c0_7 = arith.constant 0 : index
    %8 = vector.load %arg6[%c0_6, %c0_7] : memref<128x256xf32, #tpu.memory_space<vmem>>, vector<128x256xf32>
    tpu.vector_store %arg6[%c0_6, %c0_7], %7 {strides = array<i32>} : memref<128x256xf32, #tpu.memory_space<vmem>>, vector<128x256xf32>,
    %c0_i32_8 = arith.constant 0 : i32
    %9 = arith.cmpi eq, %arg1, %c0_i32_8 : i32
    %10 = arith.extui %9 : i1 to i32
    %c0_i32_9 = arith.constant 0 : i32
    %11 = arith.cmpi ne, %10, %c0_i32_9 : i32
    scf.if %11 {
      %c0_10 = arith.constant 0 : index
      %c0_11 = arith.constant 0 : index
      %12 = vector.load %arg6[%c0_10, %c0_11] : memref<128x256xf32, #tpu.memory_space<vmem>>, vector<128x256xf32>
      %cst_12 = arith.constant 0.000000e+00 : f32
      %13 = vector.broadcast %cst_12 : f32 to vector<128x256xf32>
      %14 = arith.maximumf %12, %13 : vector<128x256xf32>
      %15 = arith.truncf %14 : vector<128x256xf32> to vector<128x256xbf16>
      %c0_13 = arith.constant 0 : index
      %c0_14 = arith.constant 0 : index
      %16 = vector.load %arg4[%c0_13, %c0_14] : memref<256x128xbf16, #tpu.memory_space<vmem>>, vector<256x128xbf16>
      %cst_15 = arith.constant dense<0.000000e+00> : vector<128x128xf32>
      %17 = tpu.matmul %15, %16, %cst_15 {dimension_numbers = #tpu.dot_dimension_numbers<[1], [0], [0], [1], [0, 0, 1, 1], [], []>} : vector<128x256xbf16>, vector<256x128xbf16>, vector<128x128xf32> -> vector<128x128xf32>
      %18 = arith.truncf %17 : vector<128x128xf32> to vector<128x128xbf16>
      %c0_16 = arith.constant 0 : index
      %c0_17 = arith.constant 0 : index
      %19 = vector.load %arg5[%c0_16, %c0_17] : memref<128x128xbf16, #tpu.memory_space<vmem>>, vector<128x128xbf16>
      tpu.vector_store %arg5[%c0_16, %c0_17], %18 {strides = array<i32>} : memref<128x128xbf16, #tpu.memory_space<vmem>>, vector<128x128xbf16>,
    } else {
    }
    return
  }
  func.func @transform_0(%arg0: i32, %arg1: i32) -> (i32, i32) {
    %c0_i32 = arith.constant 0 : i32
    return %arg0, %arg1 : i32, i32
  }
  func.func @transform_1(%arg0: i32, %arg1: i32) -> (i32, i32) {
    %c0_i32 = arith.constant 0 : i32
    %c0_i32_0 = arith.constant 0 : i32
    return %arg1, %c0_i32 : i32, i32
  }
  func.func @transform_2(%arg0: i32, %arg1: i32) -> (i32, i32) {
    %c0_i32 = arith.constant 0 : i32
    %c0_i32_0 = arith.constant 0 : i32
    %c0_i32_1 = arith.constant 0 : i32
    return %c0_i32, %c0_i32_0 : i32, i32
  }
  func.func @transform_3(%arg0: i32, %arg1: i32) -> (i32, i32) {
    %c0_i32 = arith.constant 0 : i32
    %c0_i32_0 = arith.constant 0 : i32
    return %arg0, %c0_i32 : i32, i32
  }
}

</mosaic_0001>

<bundles_post_ra>
// kernel: tpu_custom_call.1
= control target key start
LH: loop header
LB: loop body
LE: loop exit
PB: predicated region body
PF: predicated region fallthrough
CT: control target
= control target key end

     0   :  { %8 = vsyncpa [#allocation4], 0  ;;  %s1219_s0 = inlined_call_operand.hbm [shape: bf16[128,128], index: 0, kind: input, shape index: {}]   ;;  %s1220_s1 = inlined_call_operand.hbm [shape: bf16[128,256], index: 1, kind: input, shape index: {}]   ;;  %s1221_s2 = inlined_call_operand.hbm [shape: bf16[256,128], index: 2, kind: input, shape index: {}]   ;;  %s1222_s3 = inlined_call_operand.hbm [shape: bf16[128,128], index: 3, kind: output, shape index: {}]  }
   0x1   :  { %9 = vsyncpa [#allocation7], 0  ;;  %s28_s14 = sshll.u32 %s1220_s1, 4  ;;  %s29_s14 = int_to_ptr.hbm [resolvable:$true] %s28_s14 }
   0x2   :  { %10 = vsyncpa [#allocation5], 0  ;;  %s1170_s15 = smov [#allocation6]   ;;  %s15_s19 = sshll.u32 %s1219_s0, 4  ;;  %s16_s19 = int_to_ptr.hbm [resolvable:$true] %s15_s19 }
   0x3   :  { %s30_s16 = sshll.u32 %s1170_s15, 4  ;;  %s1171_s20 = smov 128   ;;  %s31_s16 = int_to_ptr.vmem [resolvable:$true] %s30_s16 }
   0x4   :  { %s1172_s21 = smov 8   ;;  %s1173_s22 = smov [#allocation3]  }
   0x5   :  { %36 = dma.hbm_to_vmem [thread:$0]  %s29_s14, 2048, %s31_s16, [#allocation7], %s1171_s20, %s1171_s20, %s1172_s21  }
   0x6   :  { %s17_s23 = sshll.u32 %s1173_s22, 4  ;;  %s1174_s24 = smov 64   ;;  %s18_s23 = int_to_ptr.vmem [resolvable:$true] %s17_s23 }
   0x7   :  { %s1175_s25 = smov 4   ;;  %s41_s27 = sshll.u32 %s1221_s2, 4  ;;  %s42_s27 = int_to_ptr.hbm [resolvable:$true] %s41_s27 }
   0x8   :  { %23 = dma.hbm_to_vmem [thread:$0]  %s16_s19, 1024, %s18_s23, [#allocation4], %s1174_s24, %s1174_s24, %s1175_s25  }
   0x9   :  { %s1176_s28 = smov [#allocation8]  }
   0xa   :  { %s43_s0 = sshll.u32 %s1176_s28, 4  ;;  %s44_s0 = int_to_ptr.vmem [resolvable:$true] %s43_s0 }
   0xb   :  { %49 = dma.hbm_to_vmem [thread:$0]  %s42_s27, 2048, %s44_s0, [#allocation7], %s1174_s24, %s1174_s24, %s1175_s25  }
   0xc   :  { %1164 = dma.done.wait [#allocation4], 1024  }
   0xd   :  { %1165 = vsyncadd [#allocation4], 4294966272 }
   0xe   :  { %1166 = dma.done.wait [#allocation7], 4096  }
   0xf   :  { %1167 = vsyncadd [#allocation7], 4294963200  ;;  %v903_v0 = vld [vmem:[#allocation6 + $0x70] sm:$0xf]  ;;  %v996_v1 = vld [vmem:[#allocation6 + $0x74] sm:$0xf0] }
  0x10   :  { %v995_v2 = vld [vmem:[#allocation6 + $0x74] sm:$0xf]  ;;  %v904_v3 = vor.u32 %v996_v1, %v903_v0  ;;  %v905_v4 = vld [vmem:[#allocation6 + $0x78] sm:$0xf0]  ;;  %v895_v5 = vld [vmem:[#allocation6 + $0x60] sm:$0xf] }
  0x11   :  { %v994_v6 = vld [vmem:[#allocation6 + $0x64] sm:$0xf0]  ;;  %v908_v7 = vor.u32 %v995_v2, %v905_v4  ;;  %v993_v8 = vld [vmem:[#allocation6 + $0x64] sm:$0xf]  ;;  %v897_v9 = vld [vmem:[#allocation6 + $0x68] sm:$0xf0] }
  0x12   :  { %290 = vmatpush.bf16.msra.mxu0 %v904_v3  ;;  %v896_v10 = vor.u32 %v994_v6, %v895_v5  ;;  %v900_v11 = vor.u32 %v993_v8, %v897_v9  ;;  %v887_v12 = vld [vmem:[#allocation6 + $0x50] sm:$0xf]  ;;  %v992_v13 = vld [vmem:[#allocation6 + $0x54] sm:$0xf0]  ;;  %v991_v14 = vld [vmem:[#allocation6 + $0x54] sm:$0xf] }
  0x13   :  { %339 = vmatpush.bf16.msra.mxu1 %v908_v7  ;;  %v889_v15 = vld [vmem:[#allocation6 + $0x58] sm:$0xf0]  ;;  %v888_v16 = vor.u32 %v992_v13, %v887_v12  ;;  %v879_v18 = vld [vmem:[#allocation6 + $0x40] sm:$0xf]  ;;  %v990_v19 = vld [vmem:[#allocation6 + $0x44] sm:$0xf0] }
  0x14   :  { %v892_v17 = vor.u32 %v991_v14, %v889_v15  ;;  %v989_v20 = vld [vmem:[#allocation6 + $0x44] sm:$0xf]  ;;  %v881_v21 = vld [vmem:[#allocation6 + $0x48] sm:$0xf0]  ;;  %v880_v22 = vor.u32 %v990_v19, %v879_v18  ;;  %v871_v24 = vld [vmem:[#allocation6 + $0x30] sm:$0xf] }
  0x15   :  { %v884_v23 = vor.u32 %v989_v20, %v881_v21  ;;  %v988_v25 = vld [vmem:[#allocation6 + $0x34] sm:$0xf0]  ;;  %v987_v26 = vld [vmem:[#allocation6 + $0x34] sm:$0xf]  ;;  %v873_v27 = vld [vmem:[#allocation6 + $0x38] sm:$0xf0] }
  0x16   :  { %291 = vmatpush.bf16.msra.mxu0 %v896_v10  ;;  %v872_v28 = vor.u32 %v988_v25, %v871_v24  ;;  %v876_v29 = vor.u32 %v987_v26, %v873_v27  ;;  %v863_v30 = vld [vmem:[#allocation6 + $0x20] sm:$0xf]  ;;  %v986_v31 = vld [vmem:[#allocation6 + $0x24] sm:$0xf0]  ;;  %v985_v32 = vld [vmem:[#allocation6 + $0x24] sm:$0xf] }
  0x17   :  { %340 = vmatpush.bf16.msra.mxu1 %v900_v11  ;;  %v865_v33 = vld [vmem:[#allocation6 + $0x28] sm:$0xf0]  ;;  %v864_v34 = vor.u32 %v986_v31, %v863_v30  ;;  %v855_v36 = vld [vmem:[#allocation6 + $0x10] sm:$0xf]  ;;  %v984_v37 = vld [vmem:[#allocation6 + $0x14] sm:$0xf0] }
  0x18   :  { %v868_v35 = vor.u32 %v985_v32, %v865_v33  ;;  %v983_v38 = vld [vmem:[#allocation6 + $0x14] sm:$0xf]  ;;  %v857_v39 = vld [vmem:[#allocation6 + $0x18] sm:$0xf0]  ;;  %v856_v40 = vor.u32 %v984_v37, %v855_v36  ;;  %v847_v42 = vld [vmem:[#allocation6] sm:$0xf] }
  0x19   :  { %v860_v41 = vor.u32 %v983_v38, %v857_v39  ;;  %v982_v43 = vld [vmem:[#allocation6 + $0x4] sm:$0xf0]  ;;  %v981_v44 = vld [vmem:[#allocation6 + $0x4] sm:$0xf]  ;;  %v849_v45 = vld [vmem:[#allocation6 + $0x8] sm:$0xf0] }
  0x1a   :  { %292 = vmatpush.bf16.msra.mxu0 %v888_v16  ;;  %v848_v46 = vor.u32 %v982_v43, %v847_v42  ;;  %v852_v47 = vor.u32 %v981_v44, %v849_v45  ;;  %v973_v48 = vld [vmem:[#allocation3] sm:$0xff]  ;;  %v974_v49 = vld [vmem:[#allocation3 + $0x8] sm:$0xff]  ;;  %v975_v50 = vld [vmem:[#allocation3 + $0x10] sm:$0xff]  ;;  %s1177_s2 = smov [#allocation9]   ;;  %s799_s5 = sshll.u32 %s1222_s3, 4  ;;  %s800_s5 = int_to_ptr.hbm [resolvable:$true] %s799_s5 }
  0x1b   :  { %341 = vmatpush.bf16.msra.mxu1 %v892_v17  ;;  %v976_v51 = vld [vmem:[#allocation3 + $0x18] sm:$0xff]  ;;  %v977_v52 = vld [vmem:[#allocation3 + $0x20] sm:$0xff]  ;;  %v1003_v55 = vld [vmem:[#allocation8 + $0x30] sm:$0xff]  ;;  %s797_s29 = sshll.u32 %s1177_s2, 4  ;;  %s798_s29 = int_to_ptr.vmem [resolvable:$true] %s797_s29 }
  0x1c   :  { %v1004_v53 = vld [vmem:[#allocation8 + $0x38] sm:$0xff]  ;;  %v1011_v56 = vld [vmem:[#allocation8 + $0x70] sm:$0xff]  ;;  %v978_v57 = vld [vmem:[#allocation3 + $0x28] sm:$0xff] }
  0x1d   :  { %v1012_v54 = vld [vmem:[#allocation8 + $0x78] sm:$0xff]  ;;  %663 = vmatpush.bf16.msra.mxu2 %v1004_v53  ;;  %v1002_v58 = vld [vmem:[#allocation8 + $0x28] sm:$0xff]  ;;  %v1001_v60 = vld [vmem:[#allocation8 + $0x20] sm:$0xff] }
  0x1e   :  { %293 = vmatpush.bf16.msra.mxu0 %v880_v22  ;;  %712 = vmatpush.bf16.msra.mxu3 %v1012_v54  ;;  %v1010_v59 = vld [vmem:[#allocation8 + $0x68] sm:$0xff]  ;;  %v1009_v61 = vld [vmem:[#allocation8 + $0x60] sm:$0xff]  ;;  %v1000_v62 = vld [vmem:[#allocation8 + $0x18] sm:$0xff] }
  0x1f   :  { %342 = vmatpush.bf16.msra.mxu1 %v884_v23  ;;  %v1008_v63 = vld [vmem:[#allocation8 + $0x58] sm:$0xff]  ;;  %v979_v0 = vld [vmem:[#allocation3 + $0x30] sm:$0xff]  ;;  %v998_v3 = vld [vmem:[#allocation8 + $0x8] sm:$0xff] }
  0x20   :  { %v999_v1 = vld [vmem:[#allocation8 + $0x10] sm:$0xff]  ;;  %v1006_v4 = vld [vmem:[#allocation8 + $0x48] sm:$0xff]  ;;  %v997_v5 = vld [vmem:[#allocation8] sm:$0xff] }
  0x21   :  { %664 = vmatpush.bf16.msra.mxu2 %v1003_v55  ;;  %v1007_v2 = vld [vmem:[#allocation8 + $0x50] sm:$0xff]  ;;  %v1005_v6 = vld [vmem:[#allocation8 + $0x40] sm:$0xff]  ;;  %v980_v7 = vld [vmem:[#allocation3 + $0x38] sm:$0xff] }
  0x22   :  { %294 = vmatpush.bf16.msra.mxu0 %v872_v28  ;;  %713 = vmatpush.bf16.msra.mxu3 %v1011_v56 }
  0x23   :  { %343 = vmatpush.bf16.msra.mxu1 %v876_v29 }
  0x25   :  { %665 = vmatpush.bf16.msra.mxu2 %v1002_v58 }
  0x26   :  { %295 = vmatpush.bf16.msra.mxu0 %v864_v34  ;;  %714 = vmatpush.bf16.msra.mxu3 %v1010_v59 }
  0x27   :  { %344 = vmatpush.bf16.msra.mxu1 %v868_v35 }
  0x29   :  { %666 = vmatpush.bf16.msra.mxu2 %v1001_v60 }
  0x2a   :  { %296 = vmatpush.bf16.msra.mxu0 %v856_v40  ;;  %715 = vmatpush.bf16.msra.mxu3 %v1009_v61 }
  0x2b   :  { %345 = vmatpush.bf16.msra.mxu1 %v860_v41 }
  0x2d   :  { %667 = vmatpush.bf16.msra.mxu2 %v1000_v62 }
  0x2e   :  { %297 = vmatpush.bf16.msra.mxu0 %v848_v46  ;;  %716 = vmatpush.bf16.msra.mxu3 %v1008_v63 }
  0x2f   :  { %346 = vmatpush.bf16.msra.mxu1 %v852_v47 }
  0x31   :  { %298 = vmatmul.bf16.vlgmr.msra.gmra.mxu0 %v973_v48  ;;  %668 = vmatpush.bf16.msra.mxu2 %v999_v1 }
  0x32   :  { %347 = vmatmul.bf16.vlgmr.msra.gmra.mxu1 %v973_v48  ;;  %717 = vmatpush.bf16.msra.mxu3 %v1007_v2 }
  0x35   :  { %669 = vmatpush.bf16.msra.mxu2 %v998_v3 }
  0x36   :  { %718 = vmatpush.bf16.msra.mxu3 %v1006_v4 }
  0x39   :  { %670 = vmatpush.bf16.msra.mxu2 %v997_v5 }
  0x3a   :  { %719 = vmatpush.bf16.msra.mxu3 %v1005_v6 }
  0x41   :  { %303 = vmatmul.bf16.gmra.mxu0 %v974_v49 }
  0x42   :  { %352 = vmatmul.bf16.gmra.mxu1 %v974_v49 }
  0x51   :  { %308 = vmatmul.bf16.gmra.mxu0 %v975_v50 }
  0x52   :  { %357 = vmatmul.bf16.gmra.mxu1 %v975_v50 }
  0x61   :  { %313 = vmatmul.bf16.gmra.mxu0 %v976_v51 }
  0x62   :  { %362 = vmatmul.bf16.gmra.mxu1 %v976_v51 }
  0x71   :  { %318 = vmatmul.bf16.gmra.mxu0 %v977_v52 }
  0x72   :  { %367 = vmatmul.bf16.gmra.mxu1 %v977_v52 }
  0x81   :  { %323 = vmatmul.bf16.gmra.mxu0 %v978_v57 }
  0x82   :  { %372 = vmatmul.bf16.gmra.mxu1 %v978_v57 }
  0x91   :  { %328 = vmatmul.bf16.gmra.mxu0 %v979_v0 }
  0x92   :  { %377 = vmatmul.bf16.gmra.mxu1 %v979_v0 }
  0xa1   :  { %333 = vmatmul.bf16.gmra.mxu0 %v980_v7 }
  0xa2   :  { %382 = vmatmul.bf16.gmra.mxu1 %v980_v7 }
  0xae   :  { %v299_v8 = vpop.f32.mrf.mxu0 }
  0xaf   :  { %v348_v9 = vpop.f32.mrf.mxu1  ;;  %v487_v11 = vmax.f32 %v299_v8, 0.0 }
  0xb0   :  { %v488_v14 = vmax.f32 %v348_v9, 0.0 }
  0xb6   :  { %v301_v10 = vpop.f32.mrf.mxu0 }
  0xb7   :  { %v489_v12 = vmax.f32 %v301_v10, 0.0  ;;  %v350_v13 = vpop.f32.mrf.mxu1 }
  0xb8   :  { %v490_v15 = vmax.f32 %v350_v13, 0.0 }
  0xb9   :  { %v519_v16 = vpack.c.bf16 %v489_v12, %v487_v11 }
  0xba   :  { %v520_v17 = vpack.c.bf16 %v490_v15, %v488_v14 }
  0xbb   :  { %671 = vmatmul.bf16.vlgmr.msra.gmra.mxu2 %v519_v16 }
  0xbc   :  { %720 = vmatmul.bf16.vlgmr.msra.gmra.mxu3 %v520_v17 }
  0xbe   :  { %v304_v18 = vpop.f32.mrf.mxu0 }
  0xbf   :  { %v353_v19 = vpop.f32.mrf.mxu1  ;;  %v491_v21 = vmax.f32 %v304_v18, 0.0 }
  0xc0   :  { %v492_v24 = vmax.f32 %v353_v19, 0.0 }
  0xc6   :  { %v306_v20 = vpop.f32.mrf.mxu0 }
  0xc7   :  { %v493_v22 = vmax.f32 %v306_v20, 0.0  ;;  %v355_v23 = vpop.f32.mrf.mxu1 }
  0xc8   :  { %v494_v25 = vmax.f32 %v355_v23, 0.0 }
  0xc9   :  { %v521_v26 = vpack.c.bf16 %v493_v22, %v491_v21 }
  0xca   :  { %v522_v27 = vpack.c.bf16 %v494_v25, %v492_v24 }
  0xcb   :  { %676 = vmatmul.bf16.gmra.mxu2 %v521_v26 }
  0xcc   :  { %725 = vmatmul.bf16.gmra.mxu3 %v522_v27 }
  0xce   :  { %v309_v28 = vpop.f32.mrf.mxu0 }
  0xcf   :  { %v358_v29 = vpop.f32.mrf.mxu1  ;;  %v495_v31 = vmax.f32 %v309_v28, 0.0 }
  0xd0   :  { %v496_v34 = vmax.f32 %v358_v29, 0.0 }
  0xd6   :  { %v311_v30 = vpop.f32.mrf.mxu0 }
  0xd7   :  { %v497_v32 = vmax.f32 %v311_v30, 0.0  ;;  %v360_v33 = vpop.f32.mrf.mxu1 }
  0xd8   :  { %v498_v35 = vmax.f32 %v360_v33, 0.0 }
  0xd9   :  { %v523_v36 = vpack.c.bf16 %v497_v32, %v495_v31 }
  0xda   :  { %v524_v37 = vpack.c.bf16 %v498_v35, %v496_v34 }
  0xdb   :  { %681 = vmatmul.bf16.gmra.mxu2 %v523_v36 }
  0xdc   :  { %730 = vmatmul.bf16.gmra.mxu3 %v524_v37 }
  0xde   :  { %v314_v38 = vpop.f32.mrf.mxu0 }
  0xdf   :  { %v363_v39 = vpop.f32.mrf.mxu1  ;;  %v499_v41 = vmax.f32 %v314_v38, 0.0 }
  0xe0   :  { %v500_v44 = vmax.f32 %v363_v39, 0.0 }
  0xe6   :  { %v316_v40 = vpop.f32.mrf.mxu0 }
  0xe7   :  { %v501_v42 = vmax.f32 %v316_v40, 0.0  ;;  %v365_v43 = vpop.f32.mrf.mxu1 }
  0xe8   :  { %v502_v45 = vmax.f32 %v365_v43, 0.0 }
  0xe9   :  { %v525_v46 = vpack.c.bf16 %v501_v42, %v499_v41 }
  0xea   :  { %v526_v47 = vpack.c.bf16 %v502_v45, %v500_v44 }
  0xeb   :  { %686 = vmatmul.bf16.gmra.mxu2 %v525_v46 }
  0xec   :  { %735 = vmatmul.bf16.gmra.mxu3 %v526_v47 }
  0xee   :  { %v319_v48 = vpop.f32.mrf.mxu0 }
  0xef   :  { %v368_v49 = vpop.f32.mrf.mxu1  ;;  %v503_v51 = vmax.f32 %v319_v48, 0.0 }
  0xf0   :  { %v504_v54 = vmax.f32 %v368_v49, 0.0 }
  0xf6   :  { %v321_v50 = vpop.f32.mrf.mxu0 }
  0xf7   :  { %v505_v52 = vmax.f32 %v321_v50, 0.0  ;;  %v370_v53 = vpop.f32.mrf.mxu1 }
  0xf8   :  { %v506_v55 = vmax.f32 %v370_v53, 0.0 }
  0xf9   :  { %v527_v56 = vpack.c.bf16 %v505_v52, %v503_v51 }
  0xfa   :  { %v528_v57 = vpack.c.bf16 %v506_v55, %v504_v54 }
  0xfb   :  { %691 = vmatmul.bf16.gmra.mxu2 %v527_v56 }
  0xfc   :  { %740 = vmatmul.bf16.gmra.mxu3 %v528_v57 }
  0xfe   :  { %v324_v58 = vpop.f32.mrf.mxu0 }
  0xff   :  { %v373_v59 = vpop.f32.mrf.mxu1  ;;  %v507_v61 = vmax.f32 %v324_v58, 0.0 }
 0x100   :  { %v508_v0 = vmax.f32 %v373_v59, 0.0 }
 0x106   :  { %v326_v60 = vpop.f32.mrf.mxu0 }
 0x107   :  { %v509_v62 = vmax.f32 %v326_v60, 0.0  ;;  %v375_v63 = vpop.f32.mrf.mxu1 }
 0x108   :  { %v510_v1 = vmax.f32 %v375_v63, 0.0 }
 0x109   :  { %v529_v2 = vpack.c.bf16 %v509_v62, %v507_v61 }
 0x10a   :  { %v530_v3 = vpack.c.bf16 %v510_v1, %v508_v0 }
 0x10b   :  { %696 = vmatmul.bf16.gmra.mxu2 %v529_v2 }
 0x10c   :  { %745 = vmatmul.bf16.gmra.mxu3 %v530_v3 }
 0x10e   :  { %v329_v4 = vpop.f32.mrf.mxu0 }
 0x10f   :  { %v378_v5 = vpop.f32.mrf.mxu1  ;;  %v511_v7 = vmax.f32 %v329_v4, 0.0 }
 0x110   :  { %v512_v10 = vmax.f32 %v378_v5, 0.0 }
 0x116   :  { %v331_v6 = vpop.f32.mrf.mxu0 }
 0x117   :  { %v513_v8 = vmax.f32 %v331_v6, 0.0  ;;  %v380_v9 = vpop.f32.mrf.mxu1 }
 0x118   :  { %v514_v11 = vmax.f32 %v380_v9, 0.0 }
 0x119   :  { %v531_v12 = vpack.c.bf16 %v513_v8, %v511_v7 }
 0x11a   :  { %v532_v13 = vpack.c.bf16 %v514_v11, %v512_v10 }
 0x11b   :  { %701 = vmatmul.bf16.gmra.mxu2 %v531_v12 }
 0x11c   :  { %750 = vmatmul.bf16.gmra.mxu3 %v532_v13 }
 0x11e   :  { %v334_v14 = vpop.f32.mrf.mxu0 }
 0x11f   :  { %v383_v15 = vpop.f32.mrf.mxu1  ;;  %v515_v17 = vmax.f32 %v334_v14, 0.0 }
 0x120   :  { %v516_v20 = vmax.f32 %v383_v15, 0.0 }
 0x126   :  { %v336_v16 = vpop.f32.mrf.mxu0 }
 0x127   :  { %v517_v18 = vmax.f32 %v336_v16, 0.0  ;;  %v385_v19 = vpop.f32.mrf.mxu1 }
 0x128   :  { %v518_v21 = vmax.f32 %v385_v19, 0.0 }
 0x129   :  { %v533_v22 = vpack.c.bf16 %v517_v18, %v515_v17 }
 0x12a   :  { %v534_v23 = vpack.c.bf16 %v518_v21, %v516_v20 }
 0x12b   :  { %706 = vmatmul.bf16.gmra.mxu2 %v533_v22 }
 0x12c   :  { %755 = vmatmul.bf16.gmra.mxu3 %v534_v23 }
 0x13e   :  { %v672_v24 = vpop.f32.mrf.mxu2 }
 0x13f   :  { %v721_v25 = vpop.f32.mrf.mxu3 }
 0x140   :  { %v722_v28 = vadd.f32 %v721_v25, %v672_v24 }
 0x146   :  { %v674_v26 = vpop.f32.mrf.mxu2 }
 0x147   :  { %v723_v27 = vpop.f32.mrf.mxu3 }
 0x148   :  { %v724_v29 = vadd.f32 %v723_v27, %v674_v26 }
 0x14a   :  { %v1016_v30 = vpack.c.bf16 %v724_v29, %v722_v28 }
 0x14c   :  { %1017 = vst [vmem:[#allocation9] sm:$0xff] %v1016_v30  }
 0x14e   :  { %v677_v31 = vpop.f32.mrf.mxu2 }
 0x14f   :  { %v726_v32 = vpop.f32.mrf.mxu3 }
 0x150   :  { %v727_v35 = vadd.f32 %v726_v32, %v677_v31 }
 0x156   :  { %v679_v33 = vpop.f32.mrf.mxu2 }
 0x157   :  { %v728_v34 = vpop.f32.mrf.mxu3 }
 0x158   :  { %v729_v36 = vadd.f32 %v728_v34, %v679_v33 }
 0x15a   :  { %v1021_v37 = vpack.c.bf16 %v729_v36, %v727_v35 }
 0x15c   :  { %1053 = vst [vmem:[#allocation9 + $0x8] sm:$0xff] %v1021_v37  }
 0x15e   :  { %v682_v38 = vpop.f32.mrf.mxu2 }
 0x15f   :  { %v731_v39 = vpop.f32.mrf.mxu3 }
 0x160   :  { %v732_v42 = vadd.f32 %v731_v39, %v682_v38 }
 0x166   :  { %v684_v40 = vpop.f32.mrf.mxu2 }
 0x167   :  { %v733_v41 = vpop.f32.mrf.mxu3 }
 0x168   :  { %v734_v43 = vadd.f32 %v733_v41, %v684_v40 }
 0x16a   :  { %v1026_v44 = vpack.c.bf16 %v734_v43, %v732_v42 }
 0x16c   :  { %1054 = vst [vmem:[#allocation9 + $0x10] sm:$0xff] %v1026_v44  }
 0x16e   :  { %v687_v45 = vpop.f32.mrf.mxu2 }
 0x16f   :  { %v736_v46 = vpop.f32.mrf.mxu3 }
 0x170   :  { %v737_v49 = vadd.f32 %v736_v46, %v687_v45 }
 0x176   :  { %v689_v47 = vpop.f32.mrf.mxu2 }
 0x177   :  { %v738_v48 = vpop.f32.mrf.mxu3 }
 0x178   :  { %v739_v50 = vadd.f32 %v738_v48, %v689_v47 }
 0x17a   :  { %v1031_v51 = vpack.c.bf16 %v739_v50, %v737_v49 }
 0x17c   :  { %1055 = vst [vmem:[#allocation9 + $0x18] sm:$0xff] %v1031_v51  }
 0x17e   :  { %v692_v52 = vpop.f32.mrf.mxu2 }
 0x17f   :  { %v741_v53 = vpop.f32.mrf.mxu3 }
 0x180   :  { %v742_v56 = vadd.f32 %v741_v53, %v692_v52 }
 0x186   :  { %v694_v54 = vpop.f32.mrf.mxu2 }
 0x187   :  { %v743_v55 = vpop.f32.mrf.mxu3 }
 0x188   :  { %v744_v57 = vadd.f32 %v743_v55, %v694_v54 }
 0x18a   :  { %v1036_v58 = vpack.c.bf16 %v744_v57, %v742_v56 }
 0x18c   :  { %1056 = vst [vmem:[#allocation9 + $0x20] sm:$0xff] %v1036_v58  }
 0x18e   :  { %v697_v59 = vpop.f32.mrf.mxu2 }
 0x18f   :  { %v746_v60 = vpop.f32.mrf.mxu3 }
 0x190   :  { %v747_v63 = vadd.f32 %v746_v60, %v697_v59 }
 0x196   :  { %v699_v61 = vpop.f32.mrf.mxu2 }
 0x197   :  { %v748_v62 = vpop.f32.mrf.mxu3 }
 0x198   :  { %v749_v0 = vadd.f32 %v748_v62, %v699_v61 }
 0x19a   :  { %v1041_v1 = vpack.c.bf16 %v749_v0, %v747_v63 }
 0x19c   :  { %1057 = vst [vmem:[#allocation9 + $0x28] sm:$0xff] %v1041_v1  }
 0x19e   :  { %v702_v2 = vpop.f32.mrf.mxu2 }
 0x19f   :  { %v751_v3 = vpop.f32.mrf.mxu3 }
 0x1a0   :  { %v752_v6 = vadd.f32 %v751_v3, %v702_v2 }
 0x1a6   :  { %v704_v4 = vpop.f32.mrf.mxu2 }
 0x1a7   :  { %v753_v5 = vpop.f32.mrf.mxu3 }
 0x1a8   :  { %v754_v7 = vadd.f32 %v753_v5, %v704_v4 }
 0x1aa   :  { %v1046_v8 = vpack.c.bf16 %v754_v7, %v752_v6 }
 0x1ac   :  { %1058 = vst [vmem:[#allocation9 + $0x30] sm:$0xff] %v1046_v8  }
 0x1ae   :  { %v707_v9 = vpop.f32.mrf.mxu2 }
 0x1af   :  { %v756_v10 = vpop.f32.mrf.mxu3 }
 0x1b0   :  { %v757_v13 = vadd.f32 %v756_v10, %v707_v9 }
 0x1b6   :  { %v709_v11 = vpop.f32.mrf.mxu2 }
 0x1b7   :  { %v758_v12 = vpop.f32.mrf.mxu3 }
 0x1b8   :  { %v759_v14 = vadd.f32 %v758_v12, %v709_v11 }
 0x1ba   :  { %v1051_v15 = vpack.c.bf16 %v759_v14, %v757_v13 }
 0x1bc   :  { %1059 = vst [vmem:[#allocation9 + $0x38] sm:$0xff] %v1051_v15  }
 0x1bd   :  { %805 = dma.vmem_to_hbm [thread:$0]  %s798_s29, 1024, %s800_s5, [#allocation5], %s1174_s24, %s1174_s24, %s1175_s25  }
 0x1be   :  { %1168 = dma.done.wait [#allocation5], 1024  }
 0x1bf   :  { %1169 = vsyncadd [#allocation5], 4294966272 }
 0x1c0   :  { %810 = vsyncpa [#allocation4], 1 }
 0x1c1   :  { %811 = vsyncpa [#allocation7], 1 }
 0x1c2   :  { %812 = vsyncpa [#allocation5], 1 }

</bundles_post_ra>
